<compile_context>
chip_gen: v7x
topology: tpu7x:2x2x1
jax: 0.10.0
libtpu: 0.0.40
codegen_flags: <defaults>
</compile_context>

<pallas_src>
import functools

import jax
import jax.numpy as jnp
from jax.experimental import pallas as pl
from jax.experimental.pallas import tpu as pltpu


_FUSED_MAX_NP = 2048  # single-call two-layer path when Â (bf16) comfortably fits VMEM


# ---------------------------------------------------------------------------
# Helpers
# ---------------------------------------------------------------------------
def _round_up(x, m):
    return ((x + m - 1) // m) * m


def _vmem_limit_bytes():
    """0.75 * physical VMEM (48 MiB on v7x, 96 MiB on v5e/v6e); safe fallback 48 MiB."""
    try:
        cap = int(pltpu.get_tpu_info().vmem_capacity_bytes)
    except Exception:
        cap = 64 * 1024 * 1024
    return max(32 * 1024 * 1024, (cap * 3) // 4)


def _tile_bytes(tn, tk, np_, hp, cp):
    return (2 * tn * tk * 2      # Â tile, double-buffered bf16 (dominant stream)
            + np_ * hp * 2       # VMEM-resident XW / HW2 slab (bf16)
            + hp * cp * 2        # resident W2 (bf16)
            + 2 * tn * cp * 4    # output block (f32)
            + tn * hp * 4)       # f32 accumulator scratch (layer 1)


def _pick_tiles(np_, budget, hp, cp, tile_override=None):
    if tile_override is not None:
        return tile_override
    tn_cands = [t for t in (2048, 1024, 512, 256, 128) if np_ % t == 0]
    if np_ >= 256:  # keep >= 2 row tiles so the parallel axis can feed both v7x TCs
        tn_cands = [t for t in tn_cands if t <= np_ // 2] or [128]
    tk_cands = [t for t in (4096, 2048, 1024, 512, 256, 128) if np_ % t == 0]
    if np_ <= 4096 and np_ not in tk_cands:
        tk_cands.insert(0, np_)
    for tn in tn_cands:
        for tk in tk_cands:
            if _tile_bytes(tn, tk, np_, hp, cp) <= budget:
                return tn, tk
    return 128, 128


def _masked_log_softmax(z, valid_cols):
    lane = jax.lax.broadcasted_iota(jnp.int32, z.shape, 1)
    z = jnp.where(lane < valid_cols, z, -1e30)
    m = jnp.max(z, axis=1, keepdims=True)
    s = z - m
    return s - jnp.log(jnp.sum(jnp.exp(s), axis=1, keepdims=True))


# ---------------------------------------------------------------------------
# Fused single-call kernel (small graphs): both layers, Â loaded into VMEM once
# ---------------------------------------------------------------------------
def _fused_small_kernel(a_ref, xw1_ref, w2_ref, b1_ref, b2_ref, out_ref, *, valid_cols):
    a = a_ref[...]
    h = jnp.maximum(
        jnp.dot(a, xw1_ref[...], preferred_element_type=jnp.float32) + b1_ref[...], 0.0)
    hw2 = jnp.dot(h.astype(jnp.bfloat16), w2_ref[...],
                  preferred_element_type=jnp.float32)
    z = jnp.dot(a, hw2.astype(jnp.bfloat16),
                preferred_element_type=jnp.float32) + b2_ref[...]
    out_ref[...] = _masked_log_softmax(z, valid_cols)


def _gcn_fused_small(a_pad, xw1_pad, w2_pad, b1_pad, b2_pad, *, valid_cols):
    np_, _ = a_pad.shape
    cp = w2_pad.shape[1]
    return pl.pallas_call(
        functools.partial(_fused_small_kernel, valid_cols=valid_cols),
        out_shape=jax.ShapeDtypeStruct((np_, cp), jnp.float32),
        compiler_params=pltpu.CompilerParams(
            vmem_limit_bytes=_vmem_limit_bytes()),
    )(a_pad, xw1_pad, w2_pad, b1_pad, b2_pad)


# ---------------------------------------------------------------------------
# Tiled layer kernels (large graphs): Â streamed, XW/HW2 resident, fused epilogues
# ---------------------------------------------------------------------------
def _layer1_kernel(a_ref, xw_ref, w2_ref, b1_ref, hw2_ref, acc_ref, *, block_k):
    k = pl.program_id(1)

    @pl.when(k == 0)
    def _():
        acc_ref[...] = jnp.zeros_like(acc_ref)

    start = pl.multiple_of(k * block_k, block_k)
    acc_ref[...] += jnp.dot(a_ref[...], xw_ref[pl.ds(start, block_k), :],
                            preferred_element_type=jnp.float32)

    @pl.when(k == pl.num_programs(1) - 1)
    def _():
        h = jnp.maximum(acc_ref[...] + b1_ref[...], 0.0)        # relu(Â@XW1 + b1)
        hw2_ref[...] = jnp.dot(h.astype(jnp.bfloat16), w2_ref[...],    # fused H @ W2
                               preferred_element_type=jnp.float32).astype(hw2_ref.dtype)


def _layer2_kernel(a_ref, hw2_ref, b2_ref, out_ref, *, block_k, valid_cols):
    k = pl.program_id(1)

    @pl.when(k == 0)
    def _():
        out_ref[...] = jnp.zeros_like(out_ref)

    start = pl.multiple_of(k * block_k, block_k)
    out_ref[...] += jnp.dot(a_ref[...], hw2_ref[pl.ds(start, block_k), :],
                            preferred_element_type=jnp.float32)

    @pl.when(k == pl.num_programs(1) - 1)
    def _():
        out_ref[...] = _masked_log_softmax(out_ref[...] + b2_ref[...], valid_cols)


def _gcn_layer1(a_pad, xw1_pad, w2_pad, b1_pad, *, tile_override=None):
    np_, hp = xw1_pad.shape
    cp = w2_pad.shape[1]
    vmem_limit = _vmem_limit_bytes()
    tn, tk = _pick_tiles(np_, int(vmem_limit * 0.7), hp, cp, tile_override)
    grid = (np_ // tn, np_ // tk)
    return pl.pallas_call(
        functools.partial(_layer1_kernel, block_k=tk),
        out_shape=jax.ShapeDtypeStruct((np_, cp), jnp.bfloat16),
        grid_spec=pltpu.PrefetchScalarGridSpec(
            num_scalar_prefetch=0,
            grid=grid,
            in_specs=[
                pl.BlockSpec((tn, tk), lambda i, k: (i, k)),    # Â tile (streamed)
                pl.BlockSpec((np_, hp), lambda i, k: (0, 0)),   # XW1 slab (resident)
                pl.BlockSpec((hp, cp), lambda i, k: (0, 0)),    # W2 (resident)
                pl.BlockSpec((1, hp), lambda i, k: (0, 0)),     # b1
            ],
            out_specs=pl.BlockSpec((tn, cp), lambda i, k: (i, 0)),
            scratch_shapes=[pltpu.VMEM((tn, hp), jnp.float32)],
        ),
        compiler_params=pltpu.CompilerParams(
            dimension_semantics=("parallel", "arbitrary"),
            vmem_limit_bytes=vmem_limit,
        ),
    )(a_pad, xw1_pad, w2_pad, b1_pad)


def _gcn_layer2(a_pad, hw2_pad, b2_pad, *, valid_cols, tile_override=None):
    np_, cp = hw2_pad.shape
    vmem_limit = _vmem_limit_bytes()
    tn, tk = _pick_tiles(np_, int(vmem_limit * 0.7), cp, cp, tile_override)
    grid = (np_ // tn, np_ // tk)
    return pl.pallas_call(
        functools.partial(_layer2_kernel, block_k=tk, valid_cols=valid_cols),
        out_shape=jax.ShapeDtypeStruct((np_, cp), jnp.float32),
        grid_spec=pltpu.PrefetchScalarGridSpec(
            num_scalar_prefetch=0,
            grid=grid,
            in_specs=[
                pl.BlockSpec((tn, tk), lambda i, k: (i, k)),    # Â tile (streamed)
                pl.BlockSpec((np_, cp), lambda i, k: (0, 0)),   # HW2 slab (resident)
                pl.BlockSpec((1, cp), lambda i, k: (0, 0)),     # b2
            ],
            out_specs=pl.BlockSpec((tn, cp), lambda i, k: (i, 0)),
        ),
        compiler_params=pltpu.CompilerParams(
            dimension_semantics=("parallel", "arbitrary"),
            vmem_limit_bytes=vmem_limit,
        ),
    )(a_pad, hw2_pad, b2_pad)


# ---------------------------------------------------------------------------
# Full 2-layer GCN forward (wrapper + glue)
# ---------------------------------------------------------------------------
def gcn_forward(a_hat, x, w1, b1, w2, b2, *, force_tiled=False, tile_override=None):
    n = x.shape[0]
    hidden = w1.shape[1]
    out_dim = w2.shape[1]

    np_ = _round_up(n, 128)
    hp = _round_up(hidden, 128)
    cp = _round_up(out_dim, 128)

    # Dense Â, padded with zero rows/cols, built directly in bf16 (no f32 transient).
    a_pad = jnp.zeros((np_, np_), jnp.bfloat16).at[:n, :n].set(a_hat.astype(jnp.bfloat16))

    # Tiny feature transform X @ W1 (K = input_dim) stays as XLA glue.
    xw1 = jnp.dot(x, w1, preferred_element_type=jnp.float32)
    xw1_pad = jnp.zeros((np_, hp), jnp.bfloat16).at[:n, :hidden].set(xw1.astype(jnp.bfloat16))
    b1_pad = jnp.zeros((1, hp), jnp.float32).at[:, :hidden].set(b1.reshape(1, -1))
    w2_pad = jnp.zeros((hp, cp), jnp.bfloat16).at[:hidden, :out_dim].set(w2.astype(jnp.bfloat16))
    b2_pad = jnp.zeros((1, cp), jnp.float32).at[:, :out_dim].set(b2.reshape(1, -1))

    if (not force_tiled) and np_ <= _FUSED_MAX_NP:
        # Single pallas_call: Â in VMEM once, both layers fused.
        z = _gcn_fused_small(a_pad, xw1_pad, w2_pad, b1_pad, b2_pad, valid_cols=out_dim)
    else:
        # Layer 1 emits hw2 = relu(Â@XW1 + b1) @ W2 directly (bf16, lane-dense).
        # Padded rows of hw2 are non-zero (relu(b1)@W2) but Â's padded columns are
        # zero, so they contribute nothing to layer 2.
        hw2 = _gcn_layer1(a_pad, xw1_pad, w2_pad, b1_pad, tile_override=tile_override)
        z = _gcn_layer2(a_pad, hw2, b2_pad, valid_cols=out_dim, tile_override=tile_override)

    return z[:n, :out_dim]


# ---------------------------------------------------------------------------
# Graph construction + f32 reference
# ---------------------------------------------------------------------------
def normalized_adjacency(edge_index, num_nodes):
    """GCNConv default normalization: Â = D^-1/2 (A + I) D^-1/2."""
    src, dst = edge_index[0], edge_index[1]
    a = jnp.zeros((num_nodes, num_nodes), jnp.float32)
    a = a.at[dst, src].add(1.0)
    a = a + jnp.eye(num_nodes, dtype=jnp.float32)
    deg = jnp.sum(a, axis=1)
    dinv = jnp.where(deg > 0, 1.0 / jnp.sqrt(deg), 0.0)
    return dinv[:, None] * a * dinv[None, :]


def gcn_reference(a_hat, x, w1, b1, w2, b2):
    h = jnp.maximum(a_hat @ (x @ w1) + b1, 0.0)
    z = a_hat @ (h @ w2) + b2
    return jax.nn.log_softmax(z, axis=1)


if __name__ == "__main__":
    input_dim, hidden_dim, output_dim = 8, 16, 4
    root = jax.random.PRNGKey(0)
    kg1, kg2 = jax.random.split(root)

    def make_graph(key, n, e):
        k1, k2, k3, k4, k5, k6, k7 = jax.random.split(key, 7)
        src = jax.random.randint(k1, (e,), 0, n)
        dst = jax.random.randint(k2, (e,), 0, n)
        edge_index = jnp.stack([jnp.concatenate([src, dst]),
                                jnp.concatenate([dst, src])])  # undirected
        x = jax.random.normal(k3, (n, input_dim), jnp.float32)
        w1 = jax.random.normal(k4, (input_dim, hidden_dim), jnp.float32) * 0.1
        b1 = jax.random.normal(k5, (1, hidden_dim), jnp.float32) * 0.01
        w2 = jax.random.normal(k6, (hidden_dim, output_dim), jnp.float32) * 0.1
        b2 = jax.random.normal(k7, (1, output_dim), jnp.float32) * 0.01
        return edge_index, x, w1, b1, w2, b2

    # --- small graph: fused single-call path --------------------------------
    n1 = 32
    edge_index, x, w1, b1, w2, b2 = make_graph(kg1, n1, 64)
    a_hat = normalized_adjacency(edge_index, n1)
    out = jax.jit(gcn_forward)(a_hat, x, w1, b1, w2, b2)
    jax.block_until_ready(out)
    ref = gcn_reference(a_hat, x, w1, b1, w2, b2)
    assert out.shape == (n1, output_dim)
    assert jnp.allclose(out, ref, atol=5e-2, rtol=5e-2)

    # --- larger graph: tiled two-call path (multi row/k tiles, accumulation) ---
    n2 = 200
    edge_index2, x2, w1_2, b1_2, w2_2, b2_2 = make_graph(kg2, n2, 600)
    a_hat2 = normalized_adjacency(edge_index2, n2)
    tiled_fn = jax.jit(functools.partial(gcn_forward, force_tiled=True,
                                         tile_override=(128, 128)))
    out2 = tiled_fn(a_hat2, x2, w1_2, b1_2, w2_2, b2_2)
    jax.block_until_ready(out2)
    ref2 = gcn_reference(a_hat2, x2, w1_2, b1_2, w2_2, b2_2)
    assert out2.shape == (n2, output_dim)
    assert jnp.allclose(out2, ref2, atol=5e-2, rtol=5e-2)

    print("KERNEL_OK")
</pallas_src>

<mosaic_0001>
module attributes {stable_mosaic.version = 11 : i64} {
  func.func @_fused_small_kernel(%arg0: memref<128x128xbf16, #tpu.memory_space<vmem>>, %arg1: memref<128x128xbf16, #tpu.memory_space<vmem>>, %arg2: memref<128x128xbf16, #tpu.memory_space<vmem>>, %arg3: memref<1x128xf32, #tpu.memory_space<vmem>>, %arg4: memref<1x128xf32, #tpu.memory_space<vmem>>, %arg5: memref<128x128xf32, #tpu.memory_space<vmem>>) attributes {dimension_semantics = [], scalar_prefetch = 0 : i64, scratch_operands = 0 : i64, tpu.core_type = #tpu.core_type<tc>} {
    %c0 = arith.constant 0 : index
    %c0_0 = arith.constant 0 : index
    %0 = vector.load %arg0[%c0, %c0_0] : memref<128x128xbf16, #tpu.memory_space<vmem>>, vector<128x128xbf16>
    %c0_1 = arith.constant 0 : index
    %c0_2 = arith.constant 0 : index
    %1 = vector.load %arg1[%c0_1, %c0_2] : memref<128x128xbf16, #tpu.memory_space<vmem>>, vector<128x128xbf16>
    %cst = arith.constant dense<0.000000e+00> : vector<128x128xf32>
    %2 = tpu.matmul %0, %1, %cst {dimension_numbers = #tpu.dot_dimension_numbers<[1], [0], [0], [1], [0, 0, 1, 1], [], []>} : vector<128x128xbf16>, vector<128x128xbf16>, vector<128x128xf32> -> vector<128x128xf32>
    %c0_3 = arith.constant 0 : index
    %c0_4 = arith.constant 0 : index
    %3 = vector.load %arg3[%c0_3, %c0_4] : memref<1x128xf32, #tpu.memory_space<vmem>>, vector<1x128xf32>
    %4 = vector.broadcast %3 : vector<1x128xf32> to vector<128x128xf32>
    %5 = arith.addf %2, %4 : vector<128x128xf32>
    %cst_5 = arith.constant 0.000000e+00 : f32
    %6 = vector.broadcast %cst_5 : f32 to vector<128x128xf32>
    %7 = arith.maximumf %5, %6 : vector<128x128xf32>
    %8 = arith.truncf %7 : vector<128x128xf32> to vector<128x128xbf16>
    %c0_6 = arith.constant 0 : index
    %c0_7 = arith.constant 0 : index
    %9 = vector.load %arg2[%c0_6, %c0_7] : memref<128x128xbf16, #tpu.memory_space<vmem>>, vector<128x128xbf16>
    %cst_8 = arith.constant dense<0.000000e+00> : vector<128x128xf32>
    %10 = tpu.matmul %8, %9, %cst_8 {dimension_numbers = #tpu.dot_dimension_numbers<[1], [0], [0], [1], [0, 0, 1, 1], [], []>} : vector<128x128xbf16>, vector<128x128xbf16>, vector<128x128xf32> -> vector<128x128xf32>
    %11 = arith.truncf %10 : vector<128x128xf32> to vector<128x128xbf16>
    %cst_9 = arith.constant dense<0.000000e+00> : vector<128x128xf32>
    %12 = tpu.matmul %0, %11, %cst_9 {dimension_numbers = #tpu.dot_dimension_numbers<[1], [0], [0], [1], [0, 0, 1, 1], [], []>} : vector<128x128xbf16>, vector<128x128xbf16>, vector<128x128xf32> -> vector<128x128xf32>
    %c0_10 = arith.constant 0 : index
    %c0_11 = arith.constant 0 : index
    %13 = vector.load %arg4[%c0_10, %c0_11] : memref<1x128xf32, #tpu.memory_space<vmem>>, vector<1x128xf32>
    %14 = vector.broadcast %13 : vector<1x128xf32> to vector<128x128xf32>
    %15 = arith.addf %12, %14 : vector<128x128xf32>
    %16 = tpu.iota {dimensions = array<i32: 1>} : vector<128x128xi32>
    %c4_i32 = arith.constant 4 : i32
    %17 = vector.broadcast %c4_i32 : i32 to vector<128x128xi32>
    %18 = arith.cmpi slt, %16, %17 : vector<128x128xi32>
    %cst_12 = arith.constant -1.000000e+30 : f32
    %19 = vector.broadcast %cst_12 : f32 to vector<128x128xf32>
    %20 = arith.select %18, %15, %19 : vector<128x128xi1>, vector<128x128xf32>
    %cst_13 = arith.constant dense<0xFF800000> : vector<128xf32>
    %21 = vector.multi_reduction <maximumf>, %20, %cst_13 [1] : vector<128x128xf32> to vector<128xf32>
    %22 = vector.shape_cast %21 : vector<128xf32> to vector<128x1xf32>
    %23 = vector.broadcast %22 : vector<128x1xf32> to vector<128x128xf32>
    %24 = arith.subf %20, %23 : vector<128x128xf32>
    %25 = math.exp %24 : vector<128x128xf32>
    %cst_14 = arith.constant dense<0.000000e+00> : vector<128xf32>
    %26 = vector.multi_reduction <add>, %25, %cst_14 [1] : vector<128x128xf32> to vector<128xf32>
    %27 = vector.shape_cast %26 : vector<128xf32> to vector<128x1xf32>
    %28 = math.log %27 : vector<128x1xf32>
    %29 = vector.broadcast %28 : vector<128x1xf32> to vector<128x128xf32>
    %30 = arith.subf %24, %29 : vector<128x128xf32>
    %c0_15 = arith.constant 0 : index
    %c0_16 = arith.constant 0 : index
    %31 = vector.load %arg5[%c0_15, %c0_16] : memref<128x128xf32, #tpu.memory_space<vmem>>, vector<128x128xf32>
    tpu.vector_store %arg5[%c0_15, %c0_16], %30 {strides = array<i32>} : memref<128x128xf32, #tpu.memory_space<vmem>>, vector<128x128xf32>,
    return
  }
}

</mosaic_0001>

<bundles_post_ra>
// kernel: gcn_forward.1
= control target key start
LH: loop header
LB: loop body
LE: loop exit
PB: predicated region body
PF: predicated region fallthrough
CT: control target
= control target key end

     0   :  { %s1322_s1 = inlined_call_operand.vmem [shape: bf16[128,128], index: 1, kind: input, shape index: {}]   ;;  %s1323_s0 = inlined_call_operand.vmem [shape: bf16[128,128], index: 0, kind: input, shape index: {}]   ;;  %s1324_s2 = inlined_call_operand.vmem [shape: bf16[128,128], index: 2, kind: input, shape index: {}]   ;;  %s1325_s3 = inlined_call_operand.vmem [shape: f32[1,128], index: 3, kind: input, shape index: {}]   ;;  %s1326_s4 = inlined_call_operand.vmem [shape: f32[1,128], index: 4, kind: input, shape index: {}]   ;;  %s1327_s5 = inlined_call_operand.vmem [shape: f32[128,128], index: 5, kind: output, shape index: {}]  }
   0x1   :  { %v935_v0 = vld [vmem:[%s1322_s1] sm:$0xff]   ;;  %v936_v1 = vld [vmem:[%s1322_s1 + $0x8] sm:$0xff]   ;;  %v937_v2 = vld [vmem:[%s1322_s1 + $0x10] sm:$0xff]  }
   0x2   :  { %823 = vmatprep.subr.bf16.mxu0 %v935_v0  ;;  %v938_v3 = vld [vmem:[%s1322_s1 + $0x18] sm:$0xff]   ;;  %v943_v4 = vld [vmem:[%s1323_s0] sm:$0xff]   ;;  %v940_v6 = vld [vmem:[%s1322_s1 + $0x28] sm:$0xff]  }
   0x3   :  { %824 = vmatpush3.bf16.msra.mxu0 %v935_v0  ;;  %839 = vmatprep.mubr.bf16.mxu0 %v943_v4  ;;  %v939_v5 = vld [vmem:[%s1322_s1 + $0x20] sm:$0xff]   ;;  %v952_v8 = vld [vmem:[%s1324_s2 + $0x8] sm:$0xff]   ;;  %v941_v9 = vld [vmem:[%s1322_s1 + $0x30] sm:$0xff]  }
   0x4   :  { %825 = vmatprep.subr.bf16.mxu0 %v936_v1  ;;  %v951_v7 = vld [vmem:[%s1324_s2] sm:$0xff]   ;;  %v953_v10 = vld [vmem:[%s1324_s2 + $0x10] sm:$0xff]   ;;  %v942_v11 = vld [vmem:[%s1322_s1 + $0x38] sm:$0xff]  }
   0x5   :  { %855 = vmatprep.subr.bf16.mxu1 %v951_v7  ;;  %v954_v12 = vld [vmem:[%s1324_s2 + $0x18] sm:$0xff]   ;;  %v955_v13 = vld [vmem:[%s1324_s2 + $0x20] sm:$0xff]   ;;  %v1098_v14 = vld [vmem:[%s1323_s0 + $0x8] sm:$0xff]  }
   0x6   :  { %856 = vmatpush3.bf16.msra.mxu1 %v951_v7  ;;  %v1103_v15 = vld [vmem:[%s1323_s0 + $0x10] sm:$0xff]   ;;  %v956_v16 = vld [vmem:[%s1324_s2 + $0x28] sm:$0xff]   ;;  %v1113_v17 = vld [vmem:[%s1323_s0 + $0x18] sm:$0xff]  }
   0x7   :  { %826 = vmatpush3.bf16.msra.mxu0 %v936_v1  ;;  %857 = vmatprep.subr.bf16.mxu1 %v952_v8  ;;  %v1118_v18 = vld [vmem:[%s1323_s0 + $0x20] sm:$0xff]   ;;  %v1125_v19 = vld [vmem:[%s1323_s0 + $0x28] sm:$0xff]   ;;  %v1130_v20 = vld [vmem:[%s1323_s0 + $0x30] sm:$0xff]  }
   0x8   :  { %827 = vmatprep.subr.bf16.mxu0 %v937_v2  ;;  %v1137_v21 = vld [vmem:[%s1323_s0 + $0x38] sm:$0xff]   ;;  %v957_v22 = vld [vmem:[%s1324_s2 + $0x30] sm:$0xff]   ;;  %v749_v24 = vld [vmem:[%s1325_s3] ss:$0 sm:$0xff] }
   0x9   :  { %v958_v23 = vld [vmem:[%s1324_s2 + $0x38] sm:$0xff]  }
   0xa   :  { %858 = vmatpush3.bf16.msra.mxu1 %v952_v8 }
   0xb   :  { %828 = vmatpush3.bf16.msra.mxu0 %v937_v2  ;;  %859 = vmatprep.subr.bf16.mxu1 %v953_v10 }
   0xc   :  { %829 = vmatprep.subr.bf16.mxu0 %v938_v3 }
   0xe   :  { %860 = vmatpush3.bf16.msra.mxu1 %v953_v10 }
   0xf   :  { %830 = vmatpush3.bf16.msra.mxu0 %v938_v3  ;;  %861 = vmatprep.subr.bf16.mxu1 %v954_v12 }
  0x10   :  { %831 = vmatprep.subr.bf16.mxu0 %v939_v5 }
  0x12   :  { %862 = vmatpush3.bf16.msra.mxu1 %v954_v12 }
  0x13   :  { %832 = vmatpush3.bf16.msra.mxu0 %v939_v5  ;;  %863 = vmatprep.subr.bf16.mxu1 %v955_v13 }
  0x14   :  { %833 = vmatprep.subr.bf16.mxu0 %v940_v6 }
  0x16   :  { %864 = vmatpush3.bf16.msra.mxu1 %v955_v13 }
  0x17   :  { %834 = vmatpush3.bf16.msra.mxu0 %v940_v6  ;;  %865 = vmatprep.subr.bf16.mxu1 %v956_v16 }
  0x18   :  { %835 = vmatprep.subr.bf16.mxu0 %v941_v9 }
  0x1a   :  { %866 = vmatpush3.bf16.msra.mxu1 %v956_v16 }
  0x1b   :  { %836 = vmatpush3.bf16.msra.mxu0 %v941_v9  ;;  %867 = vmatprep.subr.bf16.mxu1 %v957_v22 }
  0x1c   :  { %837 = vmatprep.subr.bf16.mxu0 %v942_v11 }
  0x1e   :  { %868 = vmatpush3.bf16.msra.mxu1 %v957_v22 }
  0x1f   :  { %838 = vmatpush3.bf16.msra.mxu0 %v942_v11  ;;  %869 = vmatprep.subr.bf16.mxu1 %v958_v23 }
  0x22   :  { %840 = vmatmul.mubr.bf16.vlgmr.msra.gmra.mrb[0].mxu0 %v1098_v14  ;;  %870 = vmatpush3.bf16.msra.mxu1 %v958_v23 }
  0x23   :  { %843 = vmatprep.mubr.bf16.mxu0 %v1103_v15 }
  0x2a   :  { %844 = vmatmul.mubr.bf16.gmra.mrb[4].mxu0 %v1113_v17 }
  0x2b   :  { %847 = vmatprep.mubr.bf16.mxu0 %v1118_v18 }
  0x32   :  { %848 = vmatmul.mubr.bf16.gmra.mrb[8].mxu0 %v1125_v19 }
  0x33   :  { %851 = vmatprep.mubr.bf16.mxu0 %v1130_v20 }
  0x3a   :  { %852 = vmatmul.mubr.bf16.gmra.mrb[12].mxu0 %v1137_v21 }
  0x3b   :  { %903 = vmatprep.mubr.bf16.mxu0 %v943_v4 }
  0xf5   :  { %v841_v25 = vpop.f32.mrb[0].mxu0 }
  0xf6   :  { %v199_v26 = vadd.f32 %v841_v25, %v749_v24  ;;  %v190_v27 = vpop.f32.mrb[1].mxu0 }
  0xf7   :  { %v191_v28 = vadd.f32 %v749_v24, %v190_v27  ;;  %v842_v29 = vpop.f32.mrb[2].mxu0 }
  0xf8   :  { %v202_v30 = vadd.f32 %v842_v29, %v749_v24  ;;  %v193_v31 = vpop.f32.mrb[3].mxu0  ;;  %v255_v33 = vmax.f32 %v199_v26, 0.0 }
  0xf9   :  { %v194_v32 = vadd.f32 %v749_v24, %v193_v31  ;;  %v253_v35 = vmax.f32 %v191_v28, 0.0 }
  0xfa   :  { %v256_v34 = vmax.f32 %v202_v30, 0.0 }
  0xfb   :  { %v254_v36 = vmax.f32 %v194_v32, 0.0 }
  0xfc   :  { %v270_v37 = vpack.c.bf16 %v256_v34, %v255_v33 }
  0xfd   :  { %v845_v38 = vpop.f32.mrb[4].mxu0  ;;  %v269_v39 = vpack.c.bf16 %v254_v36, %v253_v35 }
  0xfe   :  { %v215_v40 = vadd.f32 %v845_v38, %v749_v24  ;;  %v206_v41 = vpop.f32.mrb[5].mxu0 }
  0xff   :  { %v207_v42 = vadd.f32 %v749_v24, %v206_v41  ;;  %v846_v43 = vpop.f32.mrb[6].mxu0  ;;  %871 = vmatprep.mubr.bf16.mxu1 %v269_v39 }
 0x100   :  { %v218_v44 = vadd.f32 %v846_v43, %v749_v24  ;;  %v209_v45 = vpop.f32.mrb[7].mxu0  ;;  %872 = vmatmul.mubr.bf16.vlgmr.msra.gmra.mrb[0].mxu1 %v270_v37  ;;  %v259_v47 = vmax.f32 %v215_v40, 0.0 }
 0x101   :  { %v210_v46 = vadd.f32 %v749_v24, %v209_v45  ;;  %v257_v49 = vmax.f32 %v207_v42, 0.0 }
 0x102   :  { %v260_v48 = vmax.f32 %v218_v44, 0.0 }
 0x103   :  { %v258_v50 = vmax.f32 %v210_v46, 0.0 }
 0x104   :  { %v272_v51 = vpack.c.bf16 %v260_v48, %v259_v47  ;;  %v550_v47 = vlaneseq }
 0x105   :  { %v271_v52 = vpack.c.bf16 %v258_v50, %v257_v49  ;;  %v849_v53 = vpop.f32.mrb[8].mxu0  ;;  %v774_v49 = vld [vmem:[%s1326_s4] ss:$0 sm:$0xff] }
 0x106   :  { %v231_v54 = vadd.f32 %v849_v53, %v749_v24  ;;  %v222_v55 = vpop.f32.mrb[9].mxu0  ;;  %v1156_v48 = vand.u32 127, %v550_v47 }
 0x107   :  { %v223_v56 = vadd.f32 %v749_v24, %v222_v55  ;;  %v850_v57 = vpop.f32.mrb[10].mxu0  ;;  %875 = vmatprep.mubr.bf16.mxu1 %v271_v52 }
 0x108   :  { %v234_v58 = vadd.f32 %v850_v57, %v749_v24  ;;  %v225_v59 = vpop.f32.mrb[11].mxu0  ;;  %876 = vmatmul.mubr.bf16.gmra.mrb[4].mxu1 %v272_v51  ;;  %v263_v61 = vmax.f32 %v231_v54, 0.0  ;;  %vm552_vm0 = vcmp.lt.s32.totalorder %v1156_v48, 4 }
 0x109   :  { %v226_v60 = vadd.f32 %v749_v24, %v225_v59  ;;  %v261_v63 = vmax.f32 %v223_v56, 0.0 }
 0x10a   :  { %v264_v62 = vmax.f32 %v234_v58, 0.0 }
 0x10b   :  { %v262_v0 = vmax.f32 %v226_v60, 0.0 }
 0x10c   :  { %v274_v1 = vpack.c.bf16 %v264_v62, %v263_v61 }
 0x10d   :  { %v273_v2 = vpack.c.bf16 %v262_v0, %v261_v63  ;;  %v853_v3 = vpop.f32.mrb[12].mxu0 }
 0x10e   :  { %v247_v4 = vadd.f32 %v853_v3, %v749_v24  ;;  %v238_v5 = vpop.f32.mrb[13].mxu0 }
 0x10f   :  { %v239_v6 = vadd.f32 %v749_v24, %v238_v5  ;;  %v854_v7 = vpop.f32.mrb[14].mxu0  ;;  %879 = vmatprep.mubr.bf16.mxu1 %v273_v2 }
 0x110   :  { %v250_v8 = vadd.f32 %v854_v7, %v749_v24  ;;  %v241_v9 = vpop.f32.mrb[15].mxu0  ;;  %880 = vmatmul.mubr.bf16.gmra.mrb[8].mxu1 %v274_v1  ;;  %v267_v11 = vmax.f32 %v247_v4, 0.0 }
 0x111   :  { %v242_v10 = vadd.f32 %v749_v24, %v241_v9  ;;  %v265_v13 = vmax.f32 %v239_v6, 0.0 }
 0x112   :  { %v268_v12 = vmax.f32 %v250_v8, 0.0 }
 0x113   :  { %v266_v16 = vmax.f32 %v242_v10, 0.0 }
 0x114   :  { %v276_v22 = vpack.c.bf16 %v268_v12, %v267_v11 }
 0x115   :  { %v275_v23 = vpack.c.bf16 %v266_v16, %v265_v13 }
 0x117   :  { %883 = vmatprep.mubr.bf16.mxu1 %v275_v23 }
 0x118   :  { %884 = vmatmul.mubr.bf16.gmra.mrb[12].mxu1 %v276_v22 }
 0x119   :  { %911 = vmatprep.mubr.bf16.mxu1 %v1118_v18 }
 0x1d3   :  { %v873_v25 = vpop.f32.mrb[0].mxu1 }
 0x1d4   :  { %v375_v26 = vpop.f32.mrb[1].mxu1 }
 0x1d5   :  { %v874_v27 = vpop.f32.mrb[2].mxu1 }
 0x1d6   :  { %v439_v28 = vpack.c.bf16 %v874_v27, %v873_v25  ;;  %v378_v29 = vpop.f32.mrb[3].mxu1 }
 0x1d7   :  { %v438_v30 = vpack.c.bf16 %v378_v29, %v375_v26 }
 0x1d9   :  { %887 = vmatprep.subr.bf16.mxu0 %v438_v30  ;;  %919 = vmatprep.subr.bf16.mxu1 %v438_v30 }
 0x1da   :  { %888 = vmatpush3.bf16.msra.mxu0 %v438_v30  ;;  %927 = vmatpush3.bf16.msra.mxu1 %v438_v30 }
 0x1db   :  { %v877_v24 = vpop.f32.mrb[4].mxu1  ;;  %889 = vmatprep.subr.bf16.mxu0 %v439_v28  ;;  %920 = vmatprep.subr.bf16.mxu1 %v439_v28 }
 0x1dc   :  { %v391_v31 = vpop.f32.mrb[5].mxu1 }
 0x1dd   :  { %v878_v32 = vpop.f32.mrb[6].mxu1 }
 0x1de   :  { %v441_v33 = vpack.c.bf16 %v878_v32, %v877_v24  ;;  %v394_v34 = vpop.f32.mrb[7].mxu1  ;;  %890 = vmatpush3.bf16.msra.mxu0 %v439_v28  ;;  %928 = vmatpush3.bf16.msra.mxu1 %v439_v28 }
 0x1df   :  { %v440_v18 = vpack.c.bf16 %v394_v34, %v391_v31 }
 0x1e1   :  { %891 = vmatprep.subr.bf16.mxu0 %v440_v18  ;;  %921 = vmatprep.subr.bf16.mxu1 %v440_v18 }
 0x1e2   :  { %892 = vmatpush3.bf16.msra.mxu0 %v440_v18  ;;  %929 = vmatpush3.bf16.msra.mxu1 %v440_v18 }
 0x1e3   :  { %v881_v35 = vpop.f32.mrb[8].mxu1  ;;  %893 = vmatprep.subr.bf16.mxu0 %v441_v33  ;;  %922 = vmatprep.subr.bf16.mxu1 %v441_v33 }
 0x1e4   :  { %v407_v36 = vpop.f32.mrb[9].mxu1 }
 0x1e5   :  { %v882_v37 = vpop.f32.mrb[10].mxu1 }
 0x1e6   :  { %v443_v38 = vpack.c.bf16 %v882_v37, %v881_v35  ;;  %v410_v39 = vpop.f32.mrb[11].mxu1  ;;  %894 = vmatpush3.bf16.msra.mxu0 %v441_v33  ;;  %930 = vmatpush3.bf16.msra.mxu1 %v441_v33 }
 0x1e7   :  { %v442_v40 = vpack.c.bf16 %v410_v39, %v407_v36 }
 0x1e9   :  { %895 = vmatprep.subr.bf16.mxu0 %v442_v40  ;;  %923 = vmatprep.subr.bf16.mxu1 %v442_v40 }
 0x1ea   :  { %896 = vmatpush3.bf16.msra.mxu0 %v442_v40  ;;  %931 = vmatpush3.bf16.msra.mxu1 %v442_v40 }
 0x1eb   :  { %v885_v41 = vpop.f32.mrb[12].mxu1  ;;  %897 = vmatprep.subr.bf16.mxu0 %v443_v38  ;;  %924 = vmatprep.subr.bf16.mxu1 %v443_v38 }
 0x1ec   :  { %v423_v42 = vpop.f32.mrb[13].mxu1 }
 0x1ed   :  { %v886_v43 = vpop.f32.mrb[14].mxu1 }
 0x1ee   :  { %v445_v44 = vpack.c.bf16 %v886_v43, %v885_v41  ;;  %v426_v45 = vpop.f32.mrb[15].mxu1  ;;  %898 = vmatpush3.bf16.msra.mxu0 %v443_v38  ;;  %932 = vmatpush3.bf16.msra.mxu1 %v443_v38 }
 0x1ef   :  { %v444_v46 = vpack.c.bf16 %v426_v45, %v423_v42 }
 0x1f1   :  { %899 = vmatprep.subr.bf16.mxu0 %v444_v46  ;;  %925 = vmatprep.subr.bf16.mxu1 %v444_v46 }
 0x1f2   :  { %900 = vmatpush3.bf16.msra.mxu0 %v444_v46  ;;  %933 = vmatpush3.bf16.msra.mxu1 %v444_v46 }
 0x1f3   :  { %901 = vmatprep.subr.bf16.mxu0 %v445_v44  ;;  %926 = vmatprep.subr.bf16.mxu1 %v445_v44 }
 0x1f6   :  { %902 = vmatpush3.bf16.msra.mxu0 %v445_v44  ;;  %934 = vmatpush3.bf16.msra.mxu1 %v445_v44 }
 0x1f9   :  { %904 = vmatmul.mubr.bf16.vlgmr.msra.gmra.mrb[16].mxu0 %v1098_v14  ;;  %912 = vmatmul.mubr.bf16.vlgmr.msra.gmra.mrb[16].mxu1 %v1125_v19 }
 0x1fa   :  { %907 = vmatprep.mubr.bf16.mxu0 %v1103_v15  ;;  %915 = vmatprep.mubr.bf16.mxu1 %v1130_v20 }
 0x201   :  { %908 = vmatmul.mubr.bf16.gmra.mrb[20].mxu0 %v1113_v17  ;;  %916 = vmatmul.mubr.bf16.gmra.mrb[20].mxu1 %v1137_v21 }
 0x2cc   :  { %v905_v50 = vpop.f32.mrb[16].mxu0  ;;  %v913_v51 = vpop.f32.mrb[16].mxu1 }
 0x2cd   :  { %v496_v14 = vadd.f32 %v905_v50, %v774_v49  ;;  %v528_v19 = vadd.f32 %v913_v51, %v774_v49  ;;  %v487_v15 = vpop.f32.mrb[17].mxu0  ;;  %v519_v52 = vpop.f32.mrb[17].mxu1 }
 0x2ce   :  { %v906_v20 = vpop.f32.mrb[18].mxu0  ;;  %v914_v53 = vpop.f32.mrb[18].mxu1  ;;  %v488_v17 = vadd.f32 %v774_v49, %v487_v15  ;;  %v520_v58 = vadd.f32 %v774_v49, %v519_v52 }
 0x2cf   :  { %v499_v54 = vadd.f32 %v906_v20, %v774_v49  ;;  %v490_v21 = vpop.f32.mrb[19].mxu0  ;;  %v522_v55 = vpop.f32.mrb[19].mxu1  ;;  %v563_v56 = vsel %vm552_vm0, %v528_v19, -1e+30  ;;  %v555_v57 = vsel %vm552_vm0, %v496_v14, -1e+30  ;;  %v531_v59 = vadd.f32 %v914_v53, %v774_v49 }
 0x2d0   :  { %589 = vmax.xlane.f32.xlu0 %v563_v56  ;;  %573 = vmax.xlane.f32.xlu1 %v555_v57  ;;  %v553_v61 = vsel %vm552_vm0, %v488_v17, -1e+30  ;;  %v491_v4 = vadd.f32 %v774_v49, %v490_v21  ;;  %v523_v5 = vadd.f32 %v774_v49, %v522_v55  ;;  %v561_v7 = vsel %vm552_vm0, %v520_v58, -1e+30 }
 0x2d1   :  { %v556_v60 = vsel %vm552_vm0, %v499_v54, -1e+30  ;;  %v564_v6 = vsel %vm552_vm0, %v531_v59, -1e+30 }
 0x2d2   :  { %v562_v12 = vsel %vm552_vm0, %v523_v5, -1e+30  ;;  %v554_v13 = vsel %vm552_vm0, %v491_v4, -1e+30 }
 0x2d4   :  { %575 = vmax.xlane.f32.xlu1 %v556_v60  ;;  %569 = vmax.xlane.f32.xlu0 %v553_v61  ;;  %v909_v62 = vpop.f32.mrb[20].mxu0  ;;  %v917_v63 = vpop.f32.mrb[20].mxu1 }
 0x2d5   :  { %v503_v0 = vpop.f32.mrb[21].mxu0  ;;  %v535_v1 = vpop.f32.mrb[21].mxu1  ;;  %v512_v10 = vadd.f32 %v909_v62, %v774_v49  ;;  %v544_v31 = vadd.f32 %v917_v63, %v774_v49 }
 0x2d6   :  { %v910_v2 = vpop.f32.mrb[22].mxu0  ;;  %v918_v3 = vpop.f32.mrb[22].mxu1  ;;  %v504_v23 = vadd.f32 %v774_v49, %v503_v0  ;;  %v536_v26 = vadd.f32 %v774_v49, %v535_v1 }
 0x2d7   :  { %v506_v8 = vpop.f32.mrb[23].mxu0  ;;  %v538_v9 = vpop.f32.mrb[23].mxu1  ;;  %v515_v11 = vadd.f32 %v910_v2, %v774_v49  ;;  %v559_v22 = vsel %vm552_vm0, %v512_v10, -1e+30  ;;  %v547_v32 = vadd.f32 %v918_v3, %v774_v49  ;;  %v1202_v34 = vsel %vm552_vm0, %v544_v31, -1e+30 }
 0x2d8   :  { %591 = vmax.xlane.f32.xlu1 %v564_v6  ;;  %585 = vmax.xlane.f32.xlu0 %v561_v7  ;;  %v507_v25 = vadd.f32 %v774_v49, %v506_v8  ;;  %v539_v27 = vadd.f32 %v774_v49, %v538_v9  ;;  %v557_v29 = vsel %vm552_vm0, %v504_v23, -1e+30  ;;  %v1192_v24 = vsel %vm552_vm0, %v536_v26, -1e+30 }
 0x2d9   :  { %v560_v16 = vsel %vm552_vm0, %v515_v11, -1e+30  ;;  %v1198_v33 = vsel %vm552_vm0, %v547_v32, -1e+30 }
 0x2da   :  { %v558_v28 = vsel %vm552_vm0, %v507_v25, -1e+30  ;;  %v1188_v30 = vsel %vm552_vm0, %v539_v27, -1e+30 }
 0x2dc   :  { %587 = vmax.xlane.f32.xlu1 %v562_v12  ;;  %571 = vmax.xlane.f32.xlu0 %v554_v13 }
 0x2e0   :  { %583 = vmax.xlane.f32.xlu1 %v560_v16  ;;  %581 = vmax.xlane.f32.xlu0 %v559_v22 }
 0x2e4   :  { %579 = vmax.xlane.f32.xlu1 %v558_v28  ;;  %577 = vmax.xlane.f32.xlu0 %v557_v29 }
 0x2e8   :  { %595 = vmax.xlane.f32.xlu1 %v1188_v30  ;;  %593 = vmax.xlane.f32.xlu0 %v1192_v24 }
 0x2ec   :  { %599 = vmax.xlane.f32.xlu1 %v1198_v33  ;;  %597 = vmax.xlane.f32.xlu0 %v1202_v34 }
 0x35d   :  { %v590_v18 = vpop.xlane.xlu0 %589  ;;  %v574_v35 = vpop.xlane.xlu1 %573 }
 0x35e   :  { %v1206_v36 = vsub.f32 %v555_v57, %v574_v35  ;;  %v1208_v37 = vsub.f32 %v563_v56, %v590_v18 }
 0x360   :  { %v621_v38 = vmul.f32 1.442695, %v1206_v36  ;;  %v637_v42 = vmul.f32 1.442695, %v1208_v37 }
 0x361   :  { %v576_v39 = vpop.xlane.xlu1 %575  ;;  %v570_v40 = vpop.xlane.xlu0 %569 }
 0x362   :  { %v1211_v41 = vsub.f32 %v556_v60, %v576_v39  ;;  %959 = vpow2.f32 %v621_v38  ;;  %v1214_v43 = vsub.f32 %v553_v61, %v570_v40 }
 0x364   :  { %v623_v44 = vmul.f32 1.442695, %v1211_v41  ;;  %v617_v49 = vmul.f32 1.442695, %v1214_v43 }
 0x365   :  { %v592_v45 = vpop.xlane.xlu1 %591  ;;  %v586_v46 = vpop.xlane.xlu0 %585 }
 0x366   :  { %961 = vpow2.f32 %v623_v44  ;;  %v1217_v47 = vsub.f32 %v564_v6, %v592_v45  ;;  %v1219_v48 = vsub.f32 %v561_v7, %v586_v46 }
 0x367   :  { %963 = vpow2.f32 %v637_v42 }
 0x368   :  { %v639_v50 = vmul.f32 1.442695, %v1217_v47  ;;  %v633_v19 = vmul.f32 1.442695, %v1219_v48 }
 0x369   :  { %v588_v51 = vpop.xlane.xlu1 %587  ;;  %v572_v14 = vpop.xlane.xlu0 %571 }
 0x36a   :  { %965 = vpow2.f32 %v639_v50  ;;  %v1224_v15 = vsub.f32 %v562_v12, %v588_v51  ;;  %v1226_v52 = vsub.f32 %v554_v13, %v572_v14 }
 0x36b   :  { %967 = vpow2.f32 %v617_v49 }
 0x36c   :  { %v619_v20 = vmul.f32 1.442695, %v1226_v52  ;;  %v960_v53 = vpop.eup %959  ;;  %969 = vpow2.f32 %v633_v19  ;;  %v635_v21 = vmul.f32 1.442695, %v1224_v15 }
 0x36d   :  { %v584_v17 = vpop.xlane.xlu1 %583  ;;  %v582_v54 = vpop.xlane.xlu0 %581  ;;  %653 = vadd.xlane.f32.xlu0 %v960_v53 }
 0x36e   :  { %v1230_v55 = vsub.f32 %v560_v16, %v584_v17  ;;  %v1232_v56 = vsub.f32 %v559_v22, %v582_v54  ;;  %971 = vpow2.f32 %v619_v20 }
 0x36f   :  { %973 = vpow2.f32 %v635_v21 }
 0x370   :  { %v962_v57 = vpop.eup %961  ;;  %v629_v58 = vmul.f32 1.442695, %v1232_v56  ;;  %v631_v62 = vmul.f32 1.442695, %v1230_v55 }
 0x371   :  { %v964_v59 = vpop.eup %963  ;;  %655 = vadd.xlane.f32.xlu1 %v962_v57  ;;  %v580_v60 = vpop.xlane.xlu1 %579 }
 0x372   :  { %v578_v61 = vpop.xlane.xlu0 %577  ;;  %v1236_v63 = vsub.f32 %v558_v28, %v580_v60  ;;  %669 = vadd.xlane.f32.xlu0 %v964_v59  ;;  %975 = vpow2.f32 %v629_v58 }
 0x373   :  { %v1238_v0 = vsub.f32 %v557_v29, %v578_v61  ;;  %977 = vpow2.f32 %v631_v62 }
 0x374   :  { %v966_v1 = vpop.eup %965  ;;  %v627_v6 = vmul.f32 1.442695, %v1236_v63 }
 0x375   :  { %v625_v2 = vmul.f32 1.442695, %v1238_v0  ;;  %v968_v3 = vpop.eup %967  ;;  %671 = vadd.xlane.f32.xlu1 %v966_v1  ;;  %v596_v4 = vpop.xlane.xlu1 %595 }
 0x376   :  { %v594_v5 = vpop.xlane.xlu0 %593  ;;  %v1243_v7 = vsub.f32 %v1188_v30, %v596_v4  ;;  %649 = vadd.xlane.f32.xlu0 %v968_v3  ;;  %v970_v9 = vpop.eup %969 }
 0x377   :  { %v1246_v8 = vsub.f32 %v1192_v24, %v594_v5  ;;  %979 = vpow2.f32 %v625_v2 }
 0x378   :  { %v972_v11 = vpop.eup %971  ;;  %981 = vpow2.f32 %v627_v6  ;;  %v643_v16 = vmul.f32 1.442695, %v1243_v7 }
 0x379   :  { %v641_v10 = vmul.f32 1.442695, %v1246_v8  ;;  %v600_v12 = vpop.xlane.xlu1 %599  ;;  %651 = vadd.xlane.f32.xlu1 %v972_v11  ;;  %v974_v25 = vpop.eup %973 }
 0x37a   :  { %v598_v13 = vpop.xlane.xlu0 %597  ;;  %665 = vadd.xlane.f32.xlu0 %v970_v9  ;;  %v1254_v23 = vsub.f32 %v1198_v33, %v600_v12 }
 0x37b   :  { %v1251_v22 = vsub.f32 %v1202_v34, %v598_v13  ;;  %983 = vpow2.f32 %v641_v10 }
 0x37c   :  { %v976_v27 = vpop.eup %975  ;;  %985 = vpow2.f32 %v643_v16  ;;  %v647_v28 = vmul.f32 1.442695, %v1254_v23 }
 0x37d   :  { %v645_v26 = vmul.f32 1.442695, %v1251_v22  ;;  %667 = vadd.xlane.f32.xlu1 %v974_v25  ;;  %v978_v29 = vpop.eup %977 }
 0x37e   :  { %661 = vadd.xlane.f32.xlu0 %v976_v27 }
 0x37f   :  { %987 = vpow2.f32 %v645_v26 }
 0x380   :  { %989 = vpow2.f32 %v647_v28 }
 0x381   :  { %v980_v30 = vpop.eup %979  ;;  %663 = vadd.xlane.f32.xlu1 %v978_v29 }
 0x382   :  { %657 = vadd.xlane.f32.xlu0 %v980_v30  ;;  %v982_v24 = vpop.eup %981 }
 0x385   :  { %v984_v31 = vpop.eup %983  ;;  %659 = vadd.xlane.f32.xlu1 %v982_v24 }
 0x386   :  { %673 = vadd.xlane.f32.xlu0 %v984_v31  ;;  %v986_v32 = vpop.eup %985 }
 0x389   :  { %v988_v33 = vpop.eup %987  ;;  %675 = vadd.xlane.f32.xlu1 %v986_v32 }
 0x38a   :  { %677 = vadd.xlane.f32.xlu0 %v988_v33  ;;  %v990_v34 = vpop.eup %989 }
 0x38d   :  { %679 = vadd.xlane.f32.xlu1 %v990_v34 }
 0x3fa   :  { %v654_v18 = vpop.xlane.xlu0 %653 }
 0x3fb   :  { %991 = vlog2.f32 %v654_v18 }
 0x3fe   :  { %v656_v35 = vpop.xlane.xlu1 %655 }
 0x3ff   :  { %993 = vlog2.f32 %v656_v35  ;;  %v670_v38 = vpop.xlane.xlu0 %669 }
 0x400   :  { %995 = vlog2.f32 %v670_v38 }
 0x402   :  { %v672_v39 = vpop.xlane.xlu1 %671 }
 0x403   :  { %997 = vlog2.f32 %v672_v39  ;;  %v650_v40 = vpop.xlane.xlu0 %649 }
 0x404   :  { %999 = vlog2.f32 %v650_v40 }
 0x405   :  { %v992_v42 = vpop.eup %991 }
 0x406   :  { %v686_v44 = vmul.f32 0.6931472, %v992_v42  ;;  %v652_v45 = vpop.xlane.xlu1 %651 }
 0x407   :  { %v666_v46 = vpop.xlane.xlu0 %665  ;;  %1001 = vlog2.f32 %v652_v45 }
 0x408   :  { %v715_v50 = vsub.f32 %v1206_v36, %v686_v44  ;;  %1003 = vlog2.f32 %v666_v46 }
 0x409   :  { %v994_v49 = vpop.eup %993 }
 0x40a   :  { %v996_v51 = vpop.eup %995  ;;  %v688_v14 = vmul.f32 0.6931472, %v994_v49  ;;  %731 = vst [vmem:[%s1327_s5 + $0x10] sm:$0xff] %v715_v50  ;;  %v668_v20 = vpop.xlane.xlu1 %667 }
 0x40b   :  { %v702_v19 = vmul.f32 0.6931472, %v996_v51  ;;  %v662_v53 = vpop.xlane.xlu0 %661  ;;  %1005 = vlog2.f32 %v668_v20 }
 0x40c   :  { %v716_v17 = vsub.f32 %v1211_v41, %v688_v14  ;;  %1007 = vlog2.f32 %v662_v53 }
 0x40d   :  { %v998_v54 = vpop.eup %997  ;;  %v723_v21 = vsub.f32 %v1208_v37, %v702_v19 }
 0x40e   :  { %v1000_v57 = vpop.eup %999  ;;  %732 = vst [vmem:[%s1327_s5 + $0x18] sm:$0xff] %v716_v17  ;;  %v704_v36 = vmul.f32 0.6931472, %v998_v54  ;;  %v664_v59 = vpop.xlane.xlu1 %663 }
 0x40f   :  { %739 = vst [vmem:[%s1327_s5 + $0x50] sm:$0xff] %v723_v21  ;;  %v682_v58 = vmul.f32 0.6931472, %v1000_v57  ;;  %v658_v60 = vpop.xlane.xlu0 %657  ;;  %1009 = vlog2.f32 %v664_v59 }
 0x410   :  { %v724_v41 = vsub.f32 %v1217_v47, %v704_v36  ;;  %1011 = vlog2.f32 %v658_v60 }
 0x411   :  { %v713_v61 = vsub.f32 %v1214_v43, %v682_v58  ;;  %v1002_v37 = vpop.eup %1001 }
 0x412   :  { %740 = vst [vmem:[%s1327_s5 + $0x58] sm:$0xff] %v724_v41  ;;  %v1004_v62 = vpop.eup %1003  ;;  %v684_v1 = vmul.f32 0.6931472, %v1002_v37  ;;  %v660_v2 = vpop.xlane.xlu1 %659 }
 0x413   :  { %729 = vst [vmem:[%s1327_s5] sm:$0xff] %v713_v61  ;;  %v674_v3 = vpop.xlane.xlu0 %673  ;;  %v698_v4 = vmul.f32 0.6931472, %v1004_v62  ;;  %1013 = vlog2.f32 %v660_v2 }
 0x414   :  { %v714_v47 = vsub.f32 %v1226_v52, %v684_v1  ;;  %1015 = vlog2.f32 %v674_v3 }
 0x415   :  { %v1006_v43 = vpop.eup %1005  ;;  %v721_v5 = vsub.f32 %v1219_v48, %v698_v4 }
 0x416   :  { %v1008_v6 = vpop.eup %1007  ;;  %730 = vst [vmem:[%s1327_s5 + $0x8] sm:$0xff] %v714_v47  ;;  %v700_v9 = vmul.f32 0.6931472, %v1006_v43  ;;  %v676_v10 = vpop.xlane.xlu1 %675 }
 0x417   :  { %v678_v11 = vpop.xlane.xlu0 %677  ;;  %737 = vst [vmem:[%s1327_s5 + $0x40] sm:$0xff] %v721_v5  ;;  %v694_v12 = vmul.f32 0.6931472, %v1008_v6  ;;  %1017 = vlog2.f32 %v676_v10 }
 0x418   :  { %v722_v52 = vsub.f32 %v1224_v15, %v700_v9  ;;  %1019 = vlog2.f32 %v678_v11 }
 0x419   :  { %v1010_v13 = vpop.eup %1009  ;;  %v719_v48 = vsub.f32 %v1232_v56, %v694_v12 }
 0x41a   :  { %v1012_v16 = vpop.eup %1011  ;;  %738 = vst [vmem:[%s1327_s5 + $0x48] sm:$0xff] %v722_v52  ;;  %v696_v25 = vmul.f32 0.6931472, %v1010_v13  ;;  %v680_v26 = vpop.xlane.xlu1 %679 }
 0x41b   :  { %735 = vst [vmem:[%s1327_s5 + $0x30] sm:$0xff] %v719_v48  ;;  %v690_v27 = vmul.f32 0.6931472, %v1012_v16  ;;  %1021 = vlog2.f32 %v680_v26 }
 0x41c   :  { %v720_v28 = vsub.f32 %v1230_v55, %v696_v25 }
 0x41d   :  { %v1014_v15 = vpop.eup %1013  ;;  %v717_v29 = vsub.f32 %v1238_v0, %v690_v27 }
 0x41e   :  { %v1016_v30 = vpop.eup %1015  ;;  %736 = vst [vmem:[%s1327_s5 + $0x38] sm:$0xff] %v720_v28  ;;  %v692_v56 = vmul.f32 0.6931472, %v1014_v15 }
 0x41f   :  { %733 = vst [vmem:[%s1327_s5 + $0x20] sm:$0xff] %v717_v29  ;;  %v706_v24 = vmul.f32 0.6931472, %v1016_v30 }
 0x420   :  { %v718_v31 = vsub.f32 %v1236_v63, %v692_v56 }
 0x421   :  { %v1018_v32 = vpop.eup %1017  ;;  %v725_v33 = vsub.f32 %v1246_v8, %v706_v24 }
 0x422   :  { %v1020_v55 = vpop.eup %1019  ;;  %734 = vst [vmem:[%s1327_s5 + $0x28] sm:$0xff] %v718_v31  ;;  %v708_v0 = vmul.f32 0.6931472, %v1018_v32 }
 0x423   :  { %741 = vst [vmem:[%s1327_s5 + $0x60] sm:$0xff] %v725_v33  ;;  %v710_v34 = vmul.f32 0.6931472, %v1020_v55 }
 0x424   :  { %v726_v18 = vsub.f32 %v1243_v7, %v708_v0 }
 0x425   :  { %v1022_v35 = vpop.eup %1021  ;;  %v727_v38 = vsub.f32 %v1251_v22, %v710_v34 }
 0x426   :  { %742 = vst [vmem:[%s1327_s5 + $0x68] sm:$0xff] %v726_v18  ;;  %v712_v63 = vmul.f32 0.6931472, %v1022_v35 }
 0x427   :  { %743 = vst [vmem:[%s1327_s5 + $0x70] sm:$0xff] %v727_v38 }
 0x428   :  { %v728_v8 = vsub.f32 %v1254_v23, %v712_v63 }
 0x42a   :  { %744 = vst [vmem:[%s1327_s5 + $0x78] sm:$0xff] %v728_v8 }

</bundles_post_ra>
